<compile_context>
chip_gen: v7x
topology: tpu7x:2x2x1
jax: 0.10.0
libtpu: 0.0.40
codegen_flags: <defaults>
</compile_context>

<pallas_src>
import functools

import jax
import jax.numpy as jnp
from jax.experimental import pallas as pl
from jax.experimental.pallas import tpu as pltpu


def _round_up(n, m):
    return ((n + m - 1) // m) * m


def _mlp_kernel(x_ref, w_ref, b_ref, o_ref, *, num_layers):
    # x_ref: (bt, F) f32   w_ref: (L, F, F) bf16   b_ref: (L, 1, F) f32
    # o_ref: (bt, F) f32
    h = x_ref[...]                                   # f32 activation, VMEM/vreg resident
    for l in range(num_layers):                      # static unroll over layers
        y = jnp.dot(h.astype(jnp.bfloat16), w_ref[l],
                    preferred_element_type=jnp.float32)   # MXU, f32 accumulation
        h = jnp.maximum(y + b_ref[l], 0.0)                 # bias + ReLU in f32 (VPU)
    o_ref[...] = h.astype(o_ref.dtype)               # lane-dense store (F % 128 == 0)


def init_qnetwork_params(key, input_size, output_size, hidden_size, num_layers):
    """Deterministic init mimicking nn.Linear default (uniform +-1/sqrt(fan_in)).

    Weights stored as (in, out): y = x @ W + b  ==  torch's x @ W_t.T + b.
    """
    params = []
    for i in range(num_layers):
        in_size = input_size if i == 0 else hidden_size
        out_size = output_size if i == num_layers - 1 else hidden_size
        key, kw, kb = jax.random.split(key, 3)
        bound = 1.0 / jnp.sqrt(jnp.float32(in_size))
        w = jax.random.uniform(kw, (in_size, out_size), jnp.float32, -bound, bound)
        b = jax.random.uniform(kb, (out_size,), jnp.float32, -bound, bound)
        params.append((w, b))
    return params


def pack_params(params):
    """Zero-pad every layer to a uniform lane-dense (F, F) and stack.

    Zero padding is exact: padded weight rows/cols and padded bias entries are
    zero, so padded activation columns stay 0 through every ReLU layer.
    """
    F = 128
    for w, _ in params:
        F = max(F, _round_up(w.shape[0], 128), _round_up(w.shape[1], 128))
    L = len(params)
    w_stack = jnp.zeros((L, F, F), jnp.float32)
    b_stack = jnp.zeros((L, 1, F), jnp.float32)
    for l, (w, b) in enumerate(params):
        w_stack = w_stack.at[l, : w.shape[0], : w.shape[1]].set(w)
        b_stack = b_stack.at[l, 0, : b.shape[0]].set(b)
    # bf16 weights: halves weight DMA bytes, full-rate MXU on v5e/v6e/v7x.
    return w_stack.astype(jnp.bfloat16), b_stack, F


@functools.partial(jax.jit, static_argnames=("input_size", "output_size"))
def qnetwork_forward(x, w_stack, b_stack, input_size, output_size):
    assert x.shape[-1] == input_size
    lead = x.shape[:-1]
    xb = x.reshape((-1, input_size)).astype(jnp.float32)
    B = xb.shape[0]
    L, F, _ = w_stack.shape

    # Pad batch to the f32 sublane multiple (8); tile in blocks of <=128 rows.
    B_pad = _round_up(max(B, 1), 8)
    if B_pad > 128:
        B_pad = _round_up(B_pad, 128)
        bt = 128
    else:
        bt = B_pad
    grid = (B_pad // bt,)

    x_pad = jnp.zeros((B_pad, F), jnp.float32).at[:B, :input_size].set(xb)

    flops = 2 * B_pad * F * F * L
    bytes_accessed = (
        w_stack.size * w_stack.dtype.itemsize
        + b_stack.size * b_stack.dtype.itemsize
        + x_pad.size * 4
        + B_pad * F * 4
    )

    # TODO(synk): for large hidden_size (w_stack no longer fits scoped VMEM,
    # esp. v7x's 64 MiB), add K/N weight tiling with an f32 accumulator scratch
    # and manual double-buffered weight prefetch (pltpu.make_async_copy).
    out = pl.pallas_call(
        functools.partial(_mlp_kernel, num_layers=L),
        out_shape=jax.ShapeDtypeStruct((B_pad, F), jnp.float32),
        grid_spec=pltpu.PrefetchScalarGridSpec(
            num_scalar_prefetch=0,
            grid=grid,
            in_specs=[
                pl.BlockSpec((bt, F), lambda i: (i, 0)),       # activations, tiled over batch
                pl.BlockSpec((L, F, F), lambda i: (0, 0, 0)),  # all weights, VMEM-resident
                pl.BlockSpec((L, 1, F), lambda i: (0, 0, 0)),  # all biases
            ],
            out_specs=pl.BlockSpec((bt, F), lambda i: (i, 0)),
        ),
        compiler_params=pltpu.CompilerParams(
            dimension_semantics=("parallel",),  # shard batch tiles across TCs (v7x)
        ),
        cost_estimate=pl.CostEstimate(
            flops=flops, transcendentals=0, bytes_accessed=bytes_accessed
        ),
    )(x_pad, w_stack, b_stack)

    y = out[:B, :output_size]
    return y.reshape(lead + (output_size,))


if __name__ == "__main__":
    batch = 2
    input_size = 16
    hidden_size = 32
    output_size = 8
    num_layers = 3

    key = jax.random.PRNGKey(0)
    key_x, key_p = jax.random.split(key)
    x = jax.random.normal(key_x, (batch, input_size), jnp.float32)
    params = init_qnetwork_params(
        key_p, input_size, output_size, hidden_size, num_layers
    )
    w_stack, b_stack, _F = pack_params(params)

    out = qnetwork_forward(x, w_stack, b_stack, input_size, output_size)
    jax.block_until_ready(out)

    # Reference in plain JAX: identical math (bf16 matmul inputs, f32 accum,
    # ReLU after every layer INCLUDING the last — matching the PyTorch
    # DeepModel, which appends nn.ReLU after the final nn.Linear).
    ref = x
    for w, b in params:
        y = jnp.dot(ref.astype(jnp.bfloat16), w.astype(jnp.bfloat16),
                    preferred_element_type=jnp.float32)
        ref = jnp.maximum(y + b, 0.0)

    assert out.shape == (batch, output_size)
    assert jnp.allclose(out, ref, atol=1e-4, rtol=1e-3), float(
        jnp.max(jnp.abs(out - ref))
    )

    print("KERNEL_OK")
</pallas_src>

<mosaic_0001>
module attributes {stable_mosaic.version = 11 : i64} {
  func.func @_mlp_kernel(%arg0: i32, %arg1: memref<8x128xf32, #tpu.memory_space<vmem>>, %arg2: memref<3x128x128xbf16, #tpu.memory_space<vmem>>, %arg3: memref<3x1x128xf32, #tpu.memory_space<vmem>>, %arg4: memref<8x128xf32, #tpu.memory_space<vmem>>) attributes {dimension_semantics = [#tpu.dimension_semantics<parallel>], iteration_bounds = array<i64: 1>, scalar_prefetch = 0 : i64, scratch_operands = 0 : i64, tpu.core_type = #tpu.core_type<tc>, window_params = [{transform_indices = @transform_0, window_bounds = array<i64: 8, 128>}, {pipeline_mode = #tpu.pipeline_mode<synchronous>, transform_indices = @transform_1, window_bounds = array<i64: 3, 128, 128>}, {pipeline_mode = #tpu.pipeline_mode<synchronous>, transform_indices = @transform_2, window_bounds = array<i64: 3, 1, 128>}, {transform_indices = @transform_3, window_bounds = array<i64: 8, 128>}]} {
    %c0 = arith.constant 0 : index
    %c0_0 = arith.constant 0 : index
    %0 = vector.load %arg1[%c0, %c0_0] : memref<8x128xf32, #tpu.memory_space<vmem>>, vector<8x128xf32>
    %1 = arith.truncf %0 : vector<8x128xf32> to vector<8x128xbf16>
    %c0_1 = arith.constant 0 : index
    %c0_2 = arith.constant 0 : index
    %c0_3 = arith.constant 0 : index
    %2 = vector.load %arg2[%c0_1, %c0_2, %c0_3] : memref<3x128x128xbf16, #tpu.memory_space<vmem>>, vector<1x128x128xbf16>
    %3 = vector.shape_cast %2 : vector<1x128x128xbf16> to vector<128x128xbf16>
    %cst = arith.constant dense<0.000000e+00> : vector<8x128xf32>
    %4 = tpu.matmul %1, %3, %cst {dimension_numbers = #tpu.dot_dimension_numbers<[1], [0], [0], [1], [0, 0, 1, 1], [], []>} : vector<8x128xbf16>, vector<128x128xbf16>, vector<8x128xf32> -> vector<8x128xf32>
    %c0_4 = arith.constant 0 : index
    %c0_5 = arith.constant 0 : index
    %c0_6 = arith.constant 0 : index
    %5 = vector.load %arg3[%c0_4, %c0_5, %c0_6] : memref<3x1x128xf32, #tpu.memory_space<vmem>>, vector<1x1x128xf32>
    %6 = vector.shape_cast %5 : vector<1x1x128xf32> to vector<1x128xf32>
    %7 = vector.broadcast %6 : vector<1x128xf32> to vector<8x128xf32>
    %8 = arith.addf %4, %7 : vector<8x128xf32>
    %cst_7 = arith.constant 0.000000e+00 : f32
    %9 = vector.broadcast %cst_7 : f32 to vector<8x128xf32>
    %10 = arith.maximumf %8, %9 : vector<8x128xf32>
    %11 = arith.truncf %10 : vector<8x128xf32> to vector<8x128xbf16>
    %c1 = arith.constant 1 : index
    %c0_8 = arith.constant 0 : index
    %c0_9 = arith.constant 0 : index
    %12 = vector.load %arg2[%c1, %c0_8, %c0_9] : memref<3x128x128xbf16, #tpu.memory_space<vmem>>, vector<1x128x128xbf16>
    %13 = vector.shape_cast %12 : vector<1x128x128xbf16> to vector<128x128xbf16>
    %cst_10 = arith.constant dense<0.000000e+00> : vector<8x128xf32>
    %14 = tpu.matmul %11, %13, %cst_10 {dimension_numbers = #tpu.dot_dimension_numbers<[1], [0], [0], [1], [0, 0, 1, 1], [], []>} : vector<8x128xbf16>, vector<128x128xbf16>, vector<8x128xf32> -> vector<8x128xf32>
    %c1_11 = arith.constant 1 : index
    %c0_12 = arith.constant 0 : index
    %c0_13 = arith.constant 0 : index
    %15 = vector.load %arg3[%c1_11, %c0_12, %c0_13] : memref<3x1x128xf32, #tpu.memory_space<vmem>>, vector<1x1x128xf32>
    %16 = vector.shape_cast %15 : vector<1x1x128xf32> to vector<1x128xf32>
    %17 = vector.broadcast %16 : vector<1x128xf32> to vector<8x128xf32>
    %18 = arith.addf %14, %17 : vector<8x128xf32>
    %cst_14 = arith.constant 0.000000e+00 : f32
    %19 = vector.broadcast %cst_14 : f32 to vector<8x128xf32>
    %20 = arith.maximumf %18, %19 : vector<8x128xf32>
    %21 = arith.truncf %20 : vector<8x128xf32> to vector<8x128xbf16>
    %c2 = arith.constant 2 : index
    %c0_15 = arith.constant 0 : index
    %c0_16 = arith.constant 0 : index
    %22 = vector.load %arg2[%c2, %c0_15, %c0_16] : memref<3x128x128xbf16, #tpu.memory_space<vmem>>, vector<1x128x128xbf16>
    %23 = vector.shape_cast %22 : vector<1x128x128xbf16> to vector<128x128xbf16>
    %cst_17 = arith.constant dense<0.000000e+00> : vector<8x128xf32>
    %24 = tpu.matmul %21, %23, %cst_17 {dimension_numbers = #tpu.dot_dimension_numbers<[1], [0], [0], [1], [0, 0, 1, 1], [], []>} : vector<8x128xbf16>, vector<128x128xbf16>, vector<8x128xf32> -> vector<8x128xf32>
    %c2_18 = arith.constant 2 : index
    %c0_19 = arith.constant 0 : index
    %c0_20 = arith.constant 0 : index
    %25 = vector.load %arg3[%c2_18, %c0_19, %c0_20] : memref<3x1x128xf32, #tpu.memory_space<vmem>>, vector<1x1x128xf32>
    %26 = vector.shape_cast %25 : vector<1x1x128xf32> to vector<1x128xf32>
    %27 = vector.broadcast %26 : vector<1x128xf32> to vector<8x128xf32>
    %28 = arith.addf %24, %27 : vector<8x128xf32>
    %cst_21 = arith.constant 0.000000e+00 : f32
    %29 = vector.broadcast %cst_21 : f32 to vector<8x128xf32>
    %30 = arith.maximumf %28, %29 : vector<8x128xf32>
    %c0_22 = arith.constant 0 : index
    %c0_23 = arith.constant 0 : index
    %31 = vector.load %arg4[%c0_22, %c0_23] : memref<8x128xf32, #tpu.memory_space<vmem>>, vector<8x128xf32>
    tpu.vector_store %arg4[%c0_22, %c0_23], %30 {strides = array<i32>} : memref<8x128xf32, #tpu.memory_space<vmem>>, vector<8x128xf32>,
    return
  }
  func.func @transform_0(%arg0: i32) -> (i32, i32) {
    %c0_i32 = arith.constant 0 : i32
    %c0_i32_0 = arith.constant 0 : i32
    return %arg0, %c0_i32 : i32, i32
  }
  func.func @transform_1(%arg0: i32) -> (i32, i32, i32) {
    %c0_i32 = arith.constant 0 : i32
    %c0_i32_0 = arith.constant 0 : i32
    %c0_i32_1 = arith.constant 0 : i32
    %c0_i32_2 = arith.constant 0 : i32
    return %c0_i32, %c0_i32_0, %c0_i32_1 : i32, i32, i32
  }
  func.func @transform_2(%arg0: i32) -> (i32, i32, i32) {
    %c0_i32 = arith.constant 0 : i32
    %c0_i32_0 = arith.constant 0 : i32
    %c0_i32_1 = arith.constant 0 : i32
    %c0_i32_2 = arith.constant 0 : i32
    return %c0_i32, %c0_i32_0, %c0_i32_1 : i32, i32, i32
  }
  func.func @transform_3(%arg0: i32) -> (i32, i32) {
    %c0_i32 = arith.constant 0 : i32
    %c0_i32_0 = arith.constant 0 : i32
    return %arg0, %c0_i32 : i32, i32
  }
}

</mosaic_0001>

<bundles_post_ra>
// kernel: qnetwork_forward.1
= control target key start
LH: loop header
LB: loop body
LE: loop exit
PB: predicated region body
PF: predicated region fallthrough
CT: control target
= control target key end

     0   :  { %8 = vsyncpa [#allocation3], 0  ;;  %s548_s12 = smov [#allocation2]   ;;  %s630_s0 = inlined_call_operand.vmem [shape: f32[8,128], index: 0, kind: input, shape index: {}]   ;;  %s631_s1 = inlined_call_operand.hbm [shape: bf16[3,128,128], index: 1, kind: input, shape index: {}]   ;;  %s632_s2 = inlined_call_operand.vmem [shape: f32[3,1,128], index: 2, kind: input, shape index: {}]   ;;  %s633_s3 = inlined_call_operand.vmem [shape: f32[8,128], index: 3, kind: output, shape index: {}]  }
   0x1   :  { %s16_s13 = sshll.u32 %s548_s12, 4  ;;  %s524_s16 = scalar_lea.hbm %s631_s1, 3072  ;;  %s17_s13 = int_to_ptr.vmem [resolvable:$true] %s16_s13 }
   0x2   :  { %p525_p0 = scmp.ne.s32.totalorder %s631_s1, %s524_s16  ;;  %p528_p1 = scmp.lt.u32.totalorder %s524_s16, %s631_s1 }
   0x4   :  { %p530_p2 = pnand %p528_p1, %p525_p0 }
   0x6   :  { %533 = shalt.err (!%p530_p2)
}
   0x7   :  { %s534_s21 = scalar_lea.vmem %s17_s13, 3072  ;;  %p539_p4 = scmp.lt.s32.totalorder %s17_s13, %s17_s13 }
   0x8   :  { %p535_p3 = scmp.ne.s32.totalorder %s17_s13, %s534_s21  ;;  %p540_p5 = scmp.lt.s32.totalorder %s534_s21, %s534_s21 }
   0xa   :  { %p541_p6 = por %p540_p5, %p539_p4 }
   0xc   :  { %p542_p7 = pnand %p541_p6, %p535_p3 }
   0xe   :  { %545 = shalt.err (!%p542_p7)
}
   0xf   :  { %s549_s22 = smov 64   ;;  %s550_s23 = smov 4  }
  0x10   :  { %22 = dma.hbm_to_vmem [thread:$0]  %s631_s1, 3072, %s17_s13, [#allocation3], %s549_s22, %s549_s22, %s550_s23  }
  0x11   :  { %546 = dma.done.wait [#allocation3], 3072  }
  0x12   :  { %547 = vsyncadd [#allocation3], 4294964224  ;;  %v551_v0 = vmov 0.0   ;;  %vm552_vm0 = vmmov 0   ;;  %v500_v1 = vld [vmem:[#allocation2] sm:$0xff]   ;;  %v501_v2 = vld [vmem:[#allocation2 + $0x8] sm:$0xff]  }
  0x13   :  { %435 = vmatprep.subr.bf16.mxu0 %v551_v0  ;;  %451 = vmatprep.mubr.msk.bf16.mxu0 %vm552_vm0, %v551_v0  ;;  %v502_v3 = vld [vmem:[#allocation2 + $0x10] sm:$0xff]   ;;  %v508_v4 = vld [vmem:[#allocation2 + $0x40] sm:$0xff]   ;;  %v503_v5 = vld [vmem:[#allocation2 + $0x18] sm:$0xff]  }
  0x14   :  { %455 = vmatprep.subr.bf16.mxu1 %v551_v0  ;;  %471 = vmatprep.mubr.msk.bf16.mxu1 %vm552_vm0, %v551_v0  ;;  %v509_v6 = vld [vmem:[#allocation2 + $0x48] sm:$0xff]   ;;  %v504_v7 = vld [vmem:[#allocation2 + $0x20] sm:$0xff]   ;;  %v510_v8 = vld [vmem:[#allocation2 + $0x50] sm:$0xff]  }
  0x15   :  { %436 = vmatpush3.bf16.msra.mxu0 %v500_v1  ;;  %456 = vmatpush3.bf16.msra.mxu1 %v508_v4  ;;  %v505_v9 = vld [vmem:[#allocation2 + $0x28] sm:$0xff]   ;;  %v511_v10 = vld [vmem:[#allocation2 + $0x58] sm:$0xff]   ;;  %v506_v11 = vld [vmem:[#allocation2 + $0x30] sm:$0xff]  }
  0x16   :  { %437 = vmatprep.subr.bf16.mxu0 %v551_v0  ;;  %457 = vmatprep.subr.bf16.mxu1 %v551_v0  ;;  %v512_v12 = vld [vmem:[#allocation2 + $0x60] sm:$0xff]   ;;  %v507_v13 = vld [vmem:[#allocation2 + $0x38] sm:$0xff]   ;;  %v513_v15 = vld [vmem:[#allocation2 + $0x68] sm:$0xff]  }
  0x17   :  { %v29_v14 = vld [vmem:[%s630_s0] sm:$0xff]  ;;  %v514_v17 = vld [vmem:[#allocation2 + $0x70] sm:$0xff]   ;;  %v515_v18 = vld [vmem:[#allocation2 + $0x78] sm:$0xff]  }
  0x18   :  { %v30_v16 = vpack.c.bf16 %v29_v14, %v29_v14  ;;  %v516_v19 = vld [vmem:[#allocation2 + $0x80] sm:$0xff]   ;;  %v517_v20 = vld [vmem:[#allocation2 + $0x88] sm:$0xff]   ;;  %v518_v21 = vld [vmem:[#allocation2 + $0x90] sm:$0xff]  }
  0x19   :  { %438 = vmatpush3.bf16.msra.mxu0 %v501_v2  ;;  %458 = vmatpush3.bf16.msra.mxu1 %v509_v6  ;;  %v519_v22 = vld [vmem:[#allocation2 + $0x98] sm:$0xff]   ;;  %v520_v23 = vld [vmem:[#allocation2 + $0xa0] sm:$0xff]   ;;  %v521_v24 = vld [vmem:[#allocation2 + $0xa8] sm:$0xff]  }
  0x1a   :  { %439 = vmatprep.subr.bf16.mxu0 %v551_v0  ;;  %459 = vmatprep.subr.bf16.mxu1 %v551_v0  ;;  %v379_v25 = vld [vmem:[%s632_s2] ss:$0 sm:$0xff]  ;;  %v522_v33 = vld [vmem:[#allocation2 + $0xb0] sm:$0xff]   ;;  %v523_v34 = vld [vmem:[#allocation2 + $0xb8] sm:$0xff]  }
  0x1b   :  { %v389_v35 = vld [vmem:[%s632_s2 + $0x1] ss:$0 sm:$0xff]  ;;  %v399_v43 = vld [vmem:[%s632_s2 + $0x2] ss:$0 sm:$0xff] }
  0x1d   :  { %440 = vmatpush3.bf16.msra.mxu0 %v502_v3  ;;  %460 = vmatpush3.bf16.msra.mxu1 %v510_v8 }
  0x1e   :  { %441 = vmatprep.subr.bf16.mxu0 %v551_v0  ;;  %461 = vmatprep.subr.bf16.mxu1 %v551_v0 }
  0x21   :  { %442 = vmatpush3.bf16.msra.mxu0 %v503_v5  ;;  %462 = vmatpush3.bf16.msra.mxu1 %v511_v10 }
  0x22   :  { %443 = vmatprep.subr.bf16.mxu0 %v551_v0  ;;  %463 = vmatprep.subr.bf16.mxu1 %v551_v0 }
  0x25   :  { %444 = vmatpush3.bf16.msra.mxu0 %v504_v7  ;;  %464 = vmatpush3.bf16.msra.mxu1 %v512_v12 }
  0x26   :  { %445 = vmatprep.subr.bf16.mxu0 %v551_v0  ;;  %465 = vmatprep.subr.bf16.mxu1 %v551_v0 }
  0x29   :  { %446 = vmatpush3.bf16.msra.mxu0 %v505_v9  ;;  %466 = vmatpush3.bf16.msra.mxu1 %v513_v15 }
  0x2a   :  { %447 = vmatprep.subr.bf16.mxu0 %v551_v0  ;;  %467 = vmatprep.subr.bf16.mxu1 %v551_v0 }
  0x2d   :  { %448 = vmatpush3.bf16.msra.mxu0 %v506_v11  ;;  %468 = vmatpush3.bf16.msra.mxu1 %v514_v17 }
  0x2e   :  { %449 = vmatprep.subr.bf16.mxu0 %v551_v0  ;;  %469 = vmatprep.subr.bf16.mxu1 %v551_v0 }
  0x31   :  { %450 = vmatpush3.bf16.msra.mxu0 %v507_v13  ;;  %470 = vmatpush3.bf16.msra.mxu1 %v515_v18 }
  0x32   :  { %475 = vmatprep.subr.bf16.mxu0 %v551_v0 }
  0x34   :  { %452 = vmatmul.mubr.bf16.vlgmr.msra.gmra.mrb[0].mxu0 %v30_v16 }
  0x35   :  { %491 = vmatprep.mubr.msk.bf16.mxu0 %vm552_vm0, %v551_v0  ;;  %476 = vmatpush3.bf16.msra.mxu0 %v516_v19 }
  0x36   :  { %477 = vmatprep.subr.bf16.mxu0 %v551_v0 }
  0x39   :  { %478 = vmatpush3.bf16.msra.mxu0 %v517_v20 }
  0x3a   :  { %479 = vmatprep.subr.bf16.mxu0 %v551_v0 }
  0x3d   :  { %480 = vmatpush3.bf16.msra.mxu0 %v518_v21 }
  0x3e   :  { %481 = vmatprep.subr.bf16.mxu0 %v551_v0 }
  0x41   :  { %482 = vmatpush3.bf16.msra.mxu0 %v519_v22 }
  0x42   :  { %483 = vmatprep.subr.bf16.mxu0 %v551_v0 }
  0x45   :  { %484 = vmatpush3.bf16.msra.mxu0 %v520_v23 }
  0x46   :  { %485 = vmatprep.subr.bf16.mxu0 %v551_v0 }
  0x49   :  { %486 = vmatpush3.bf16.msra.mxu0 %v521_v24 }
  0x4a   :  { %487 = vmatprep.subr.bf16.mxu0 %v551_v0 }
  0x4d   :  { %488 = vmatpush3.bf16.msra.mxu0 %v522_v33 }
  0x4e   :  { %489 = vmatprep.subr.bf16.mxu0 %v551_v0 }
  0x51   :  { %490 = vmatpush3.bf16.msra.mxu0 %v523_v34 }
 0x107   :  { %v136_v26 = vpop.f32.mrb[0].mxu0 }
 0x108   :  { %v137_v27 = vadd.f32 %v379_v25, %v136_v26  ;;  %v453_v28 = vpop.f32.mrb[1].mxu0 }
 0x109   :  { %v139_v29 = vpop.f32.mrb[2].mxu0 }
 0x10a   :  { %v142_v30 = vmax.f32 %v137_v27, 0.0  ;;  %v454_v31 = vpop.f32.mrb[3].mxu0 }
 0x10c   :  { %v143_v32 = vpack.c.bf16 %v142_v30, %v142_v30 }
 0x10e   :  { %472 = vmatmul.mubr.bf16.vlgmr.msra.gmra.mrb[0].mxu1 %v143_v32 }
 0x1e1   :  { %v251_v36 = vpop.f32.mrb[0].mxu1 }
 0x1e2   :  { %v252_v37 = vadd.f32 %v389_v35, %v251_v36  ;;  %v473_v38 = vpop.f32.mrb[1].mxu1 }
 0x1e3   :  { %v254_v39 = vpop.f32.mrb[2].mxu1 }
 0x1e4   :  { %v257_v40 = vmax.f32 %v252_v37, 0.0  ;;  %v474_v41 = vpop.f32.mrb[3].mxu1 }
 0x1e6   :  { %v258_v42 = vpack.c.bf16 %v257_v40, %v257_v40 }
 0x1e8   :  { %492 = vmatmul.mubr.bf16.vlgmr.msra.gmra.mrb[4].mxu0 %v258_v42 }
 0x2bb   :  { %v366_v44 = vpop.f32.mrb[4].mxu0 }
 0x2bc   :  { %v367_v45 = vadd.f32 %v399_v43, %v366_v44  ;;  %v493_v46 = vpop.f32.mrb[5].mxu0 }
 0x2bd   :  { %v369_v47 = vpop.f32.mrb[6].mxu0 }
 0x2be   :  { %v372_v48 = vmax.f32 %v367_v45, 0.0  ;;  %v494_v49 = vpop.f32.mrb[7].mxu0 }
 0x2c0   :  { %373 = vst [vmem:[%s633_s3] sm:$0xff] %v372_v48 }
 0x2c1   :  { %378 = vsyncpa [#allocation3], 1 }

</bundles_post_ra>
